<compile_context>
chip_gen: v7x
topology: tpu7x:2x2x1
jax: 0.10.0
libtpu: 0.0.40
codegen_flags: <defaults>
</compile_context>

<pallas_src>
import functools

import jax
import jax.numpy as jnp
from jax import lax
from jax.experimental import pallas as pl
from jax.experimental.pallas import tpu as pltpu


def _round_up(x, m):
    return ((x + m - 1) // m) * m


def _mmd_tile_kernel(bw_ref, xr_ref, xc_ref, out_ref, acc_ref, *,
                     tile, n_src, n_tgt, kernel_mul, kernel_num):
    i = pl.program_id(0)
    j = pl.program_id(1)

    @pl.when((i == 0) & (j == 0))
    def _():
        acc_ref[0] = 0.0

    xr = xr_ref[...]                     # (TILE, Dp), original dtype
    xc = xc_ref[...]                     # (TILE, Dp)

    # Pairwise squared L2 distances for this tile via the Gram trick (MXU).
    # Contract dim 1 of both operands -> no explicit (Dp, TILE) transpose.
    gram = lax.dot_general(
        xr, xc, dimension_numbers=(((1,), (1,)), ((), ())),
        preferred_element_type=jnp.float32)                   # (TILE, TILE)
    xr32 = xr.astype(jnp.float32)
    xc32 = xc.astype(jnp.float32)
    sq_r = jnp.sum(xr32 * xr32, axis=1, keepdims=True)        # (TILE, 1)
    sq_c = jnp.sum(xc32 * xc32, axis=1, keepdims=True)        # (TILE, 1)
    l2 = jnp.maximum(sq_r + sq_c.T - 2.0 * gram, 0.0)         # (TILE, TILE)

    # Multi-bandwidth exp-sum; bw_ref holds -1/bandwidth (scalar).
    scaled = l2 * bw_ref[0, 0]
    ksum = jnp.exp(scaled)
    for p in range(1, kernel_num):
        ksum = ksum + jnp.exp(scaled * (1.0 / (kernel_mul ** p)))

    # Signed quadrant weights: +1/b for source rows/cols, -1/m for target,
    # 0 for padding rows.  sum_ij w_i w_j K_ij == XX + YY - XY - YX.
    row_ids = i * tile + lax.broadcasted_iota(jnp.int32, (tile, 1), 0)
    col_ids = j * tile + lax.broadcasted_iota(jnp.int32, (1, tile), 1)

    def weights(ids):
        return jnp.where(
            ids < n_src, 1.0 / n_src,
            jnp.where(ids < n_src + n_tgt, -1.0 / n_tgt, 0.0)
        ).astype(jnp.float32)

    w_r = weights(row_ids)               # (TILE, 1)
    w_c = weights(col_ids)               # (1, TILE)

    acc_ref[0] += jnp.sum(ksum * w_r * w_c)
    out_ref[0, 0] = acc_ref[0]           # last grid step leaves the final value


def mmd_loss(source, target, kernel_mul=2.0, kernel_num=5):
    """Pallas implementation of MMD_loss.forward (fix_sigma=None)."""
    assert source.ndim == 2 and target.ndim == 2
    assert source.shape[1] == target.shape[1]
    b, d = source.shape
    m = target.shape[0]
    n = b + m

    total = jnp.concatenate([source, target], axis=0)        # (N, D)

    # ---- O(N*D) prologue: closed-form bandwidth (no NxN L2 needed) --------
    t32 = total.astype(jnp.float32)
    sum_sq = jnp.sum(t32 * t32)                               # sum_i ||x_i||^2
    col_sum = jnp.sum(t32, axis=0)                            # sum_i x_i
    sum_l2 = 2.0 * n * sum_sq - 2.0 * jnp.sum(col_sum * col_sum)
    bandwidth = sum_l2 / float(n * n - n)
    bandwidth = bandwidth / (kernel_mul ** (kernel_num // 2))
    bandwidth = jnp.maximum(bandwidth, 1e-12)                 # guard degenerate input
    neg_inv_bw = (-1.0 / bandwidth).astype(jnp.float32).reshape(1, 1)

    # ---- padding & tile selection -----------------------------------------
    itemsize = jnp.dtype(total.dtype).itemsize
    d_pad = _round_up(d, 128)
    # Keep the two double-buffered operand blocks inside a conservative VMEM
    # budget; cap at 256 rows (fits v5e/v6e/v7x defaults comfortably).
    budget = 12 * 1024 * 1024
    rows_by_vmem = max(8, budget // max(1, 4 * d_pad * itemsize))
    tile = min(256, (rows_by_vmem // 8) * 8)
    if n <= tile:
        tile = _round_up(n, 8)
    n_pad = _round_up(n, tile)

    total_p = jnp.pad(total, ((0, n_pad - n), (0, d_pad - d)))

    grid = (n_pad // tile, n_pad // tile)
    num_tiles = grid[0] * grid[1]

    kernel = functools.partial(
        _mmd_tile_kernel, tile=tile, n_src=b, n_tgt=m,
        kernel_mul=float(kernel_mul), kernel_num=int(kernel_num))

    cost = pl.CostEstimate(
        flops=int(2 * n_pad * n_pad * d_pad + 10 * n_pad * n_pad),
        transcendentals=int(kernel_num * n_pad * n_pad),
        bytes_accessed=int(num_tiles * 2 * tile * d_pad * itemsize + 8))

    out = pl.pallas_call(
        kernel,
        out_shape=jax.ShapeDtypeStruct((1, 1), jnp.float32),
        grid=grid,
        in_specs=[
            pl.BlockSpec(memory_space=pltpu.MemorySpace.SMEM),     # -1/bandwidth
            pl.BlockSpec((tile, d_pad), lambda i, j: (i, 0)),      # row block
            pl.BlockSpec((tile, d_pad), lambda i, j: (j, 0)),      # col block
        ],
        out_specs=pl.BlockSpec(memory_space=pltpu.MemorySpace.SMEM),
        scratch_shapes=[pltpu.SMEM((1,), jnp.float32)],
        compiler_params=pltpu.CompilerParams(
            dimension_semantics=("arbitrary", "arbitrary")),
        cost_estimate=cost,
    )(neg_inv_bw, total_p, total_p)
    return out[0, 0]


def _mmd_loss_ref(source, target, kernel_mul=2.0, kernel_num=5):
    """Pure-JAX reference mirroring the PyTorch module (sanity check)."""
    b = source.shape[0]
    total = jnp.concatenate([source, target], axis=0).astype(jnp.float32)
    n = total.shape[0]
    diff = total[None, :, :] - total[:, None, :]
    l2 = jnp.sum(diff ** 2, axis=2)
    bandwidth = jnp.sum(l2) / (n * n - n)
    bandwidth = bandwidth / (kernel_mul ** (kernel_num // 2))
    kernels = sum(jnp.exp(-l2 / (bandwidth * kernel_mul ** i))
                  for i in range(kernel_num))
    xx = jnp.mean(kernels[:b, :b])
    yy = jnp.mean(kernels[b:, b:])
    xy = jnp.mean(kernels[:b, b:])
    yx = jnp.mean(kernels[b:, :b])
    return xx + yy - xy - yx


if __name__ == "__main__":
    key = jax.random.PRNGKey(0)
    k1, k2, k3, k4 = jax.random.split(key, 4)

    # Small case (single-tile grid), consistent with the module's flattened
    # feature-vector usage.
    B, D = 4, 32
    src = jax.random.normal(k1, (B, D), dtype=jnp.float32)
    tgt = jax.random.normal(k2, (B, D), dtype=jnp.float32) + 0.5
    loss = jax.block_until_ready(mmd_loss(src, tgt))
    ref = jax.block_until_ready(_mmd_loss_ref(src, tgt))
    assert jnp.isfinite(loss), "non-finite loss (small case)"
    assert jnp.allclose(loss, ref, rtol=1e-3, atol=1e-5), (loss, ref)

    # Larger case exercising the 2-D tile grid plus row & feature padding.
    B2, D2 = 160, 200
    src2 = jax.random.normal(k3, (B2, D2), dtype=jnp.float32)
    tgt2 = jax.random.normal(k4, (B2, D2), dtype=jnp.float32) + 0.25
    loss2 = jax.block_until_ready(mmd_loss(src2, tgt2))
    ref2 = jax.block_until_ready(_mmd_loss_ref(src2, tgt2))
    assert jnp.isfinite(loss2), "non-finite loss (tiled case)"
    assert jnp.allclose(loss2, ref2, rtol=2e-3, atol=1e-4), (loss2, ref2)

    print("KERNEL_OK")
</pallas_src>

<mosaic_0001>
module attributes {stable_mosaic.version = 11 : i64} {
  func.func @_mmd_tile_kernel(%arg0: i32, %arg1: i32, %arg2: memref<1x1xf32, #tpu.memory_space<smem>>, %arg3: memref<8x128xf32, #tpu.memory_space<vmem>>, %arg4: memref<8x128xf32, #tpu.memory_space<vmem>>, %arg5: memref<1x1xf32, #tpu.memory_space<smem>>, %arg6: memref<1xf32, #tpu.memory_space<smem>>) attributes {dimension_semantics = [#tpu.dimension_semantics<arbitrary>, #tpu.dimension_semantics<arbitrary>], iteration_bounds = array<i64: 1, 1>, scalar_prefetch = 0 : i64, scratch_operands = 1 : i64, tpu.core_type = #tpu.core_type<tc>, window_params = [{transform_indices = @transform_0, window_bounds = array<i64: 1, 1>}, {transform_indices = @transform_1, window_bounds = array<i64: 8, 128>}, {transform_indices = @transform_2, window_bounds = array<i64: 8, 128>}, {transform_indices = @transform_3, window_bounds = array<i64: 1, 1>}]} {
    %c0_i32 = arith.constant 0 : i32
    %0 = arith.cmpi eq, %arg0, %c0_i32 : i32
    %c0_i32_0 = arith.constant 0 : i32
    %1 = arith.cmpi eq, %arg1, %c0_i32_0 : i32
    %2 = arith.andi %0, %1 : i1
    %3 = arith.extui %2 : i1 to i32
    %c0_i32_1 = arith.constant 0 : i32
    %4 = arith.cmpi ne, %3, %c0_i32_1 : i32
    scf.if %4 {
      %cst_31 = arith.constant 0.000000e+00 : f32
      %c0_32 = arith.constant 0 : index
      %82 = memref.load %arg6[%c0_32] : memref<1xf32, #tpu.memory_space<smem>>
      memref.store %cst_31, %arg6[%c0_32] : memref<1xf32, #tpu.memory_space<smem>>
    } else {
    }
    %c0 = arith.constant 0 : index
    %c0_2 = arith.constant 0 : index
    %5 = vector.load %arg3[%c0, %c0_2] : memref<8x128xf32, #tpu.memory_space<vmem>>, vector<8x128xf32>
    %c0_3 = arith.constant 0 : index
    %c0_4 = arith.constant 0 : index
    %6 = vector.load %arg4[%c0_3, %c0_4] : memref<8x128xf32, #tpu.memory_space<vmem>>, vector<8x128xf32>
    %cst = arith.constant dense<0.000000e+00> : vector<8x8xf32>
    %7 = tpu.matmul %5, %6, %cst {dimension_numbers = #tpu.dot_dimension_numbers<[1], [1], [0], [0], [0, 0, 1, 0], [], []>} : vector<8x128xf32>, vector<8x128xf32>, vector<8x8xf32> -> vector<8x8xf32>
    %8 = arith.mulf %5, %5 : vector<8x128xf32>
    %cst_5 = arith.constant dense<0.000000e+00> : vector<8xf32>
    %9 = vector.multi_reduction <add>, %8, %cst_5 [1] : vector<8x128xf32> to vector<8xf32>
    %10 = vector.shape_cast %9 : vector<8xf32> to vector<8x1xf32>
    %11 = arith.mulf %6, %6 : vector<8x128xf32>
    %cst_6 = arith.constant dense<0.000000e+00> : vector<8xf32>
    %12 = vector.multi_reduction <add>, %11, %cst_6 [1] : vector<8x128xf32> to vector<8xf32>
    %13 = vector.shape_cast %12 : vector<8xf32> to vector<8x1xf32>
    %14 = tpu.transpose %13, [1, 0] : vector<8x1xf32> -> vector<1x8xf32>
    %15 = vector.broadcast %10 : vector<8x1xf32> to vector<8x8xf32>
    %16 = vector.broadcast %14 : vector<1x8xf32> to vector<8x8xf32>
    %17 = arith.addf %15, %16 : vector<8x8xf32>
    %cst_7 = arith.constant 2.000000e+00 : f32
    %18 = vector.broadcast %cst_7 : f32 to vector<8x8xf32>
    %19 = arith.mulf %18, %7 : vector<8x8xf32>
    %20 = arith.subf %17, %19 : vector<8x8xf32>
    %cst_8 = arith.constant 0.000000e+00 : f32
    %21 = vector.broadcast %cst_8 : f32 to vector<8x8xf32>
    %22 = arith.maximumf %20, %21 : vector<8x8xf32>
    %c0_9 = arith.constant 0 : index
    %c0_10 = arith.constant 0 : index
    %23 = memref.load %arg2[%c0_9, %c0_10] : memref<1x1xf32, #tpu.memory_space<smem>>
    %24 = vector.broadcast %23 : f32 to vector<8x8xf32>
    %25 = arith.mulf %22, %24 : vector<8x8xf32>
    %26 = math.exp %25 : vector<8x8xf32>
    %cst_11 = arith.constant 5.000000e-01 : f32
    %27 = vector.broadcast %cst_11 : f32 to vector<8x8xf32>
    %28 = arith.mulf %25, %27 : vector<8x8xf32>
    %29 = math.exp %28 : vector<8x8xf32>
    %30 = arith.addf %26, %29 : vector<8x8xf32>
    %cst_12 = arith.constant 2.500000e-01 : f32
    %31 = vector.broadcast %cst_12 : f32 to vector<8x8xf32>
    %32 = arith.mulf %25, %31 : vector<8x8xf32>
    %33 = math.exp %32 : vector<8x8xf32>
    %34 = arith.addf %30, %33 : vector<8x8xf32>
    %cst_13 = arith.constant 1.250000e-01 : f32
    %35 = vector.broadcast %cst_13 : f32 to vector<8x8xf32>
    %36 = arith.mulf %25, %35 : vector<8x8xf32>
    %37 = math.exp %36 : vector<8x8xf32>
    %38 = arith.addf %34, %37 : vector<8x8xf32>
    %cst_14 = arith.constant 6.250000e-02 : f32
    %39 = vector.broadcast %cst_14 : f32 to vector<8x8xf32>
    %40 = arith.mulf %25, %39 : vector<8x8xf32>
    %41 = math.exp %40 : vector<8x8xf32>
    %42 = arith.addf %38, %41 : vector<8x8xf32>
    %c8_i32 = arith.constant 8 : i32
    %43 = arith.muli %arg0, %c8_i32 : i32
    %44 = tpu.iota {dimensions = array<i32: 0>} : vector<8x1xi32>
    %45 = vector.broadcast %43 : i32 to vector<8x1xi32>
    %46 = arith.addi %45, %44 : vector<8x1xi32>
    %c8_i32_15 = arith.constant 8 : i32
    %47 = arith.muli %arg1, %c8_i32_15 : i32
    %48 = tpu.iota {dimensions = array<i32: 1>} : vector<1x8xi32>
    %49 = vector.broadcast %47 : i32 to vector<1x8xi32>
    %50 = arith.addi %49, %48 : vector<1x8xi32>
    %c4_i32 = arith.constant 4 : i32
    %51 = vector.broadcast %c4_i32 : i32 to vector<8x1xi32>
    %52 = arith.cmpi slt, %46, %51 : vector<8x1xi32>
    %c8_i32_16 = arith.constant 8 : i32
    %53 = vector.broadcast %c8_i32_16 : i32 to vector<8x1xi32>
    %54 = arith.cmpi slt, %46, %53 : vector<8x1xi32>
    %cst_17 = arith.constant -2.500000e-01 : f32
    %cst_18 = arith.constant 0.000000e+00 : f32
    %55 = vector.broadcast %cst_17 : f32 to vector<8x1xf32>
    %56 = vector.broadcast %cst_18 : f32 to vector<8x1xf32>
    %57 = arith.select %54, %55, %56 : vector<8x1xi1>, vector<8x1xf32>
    %cst_19 = arith.constant 2.500000e-01 : f32
    %58 = vector.broadcast %cst_19 : f32 to vector<8x1xf32>
    %59 = arith.select %52, %58, %57 : vector<8x1xi1>, vector<8x1xf32>
    %c4_i32_20 = arith.constant 4 : i32
    %60 = vector.broadcast %c4_i32_20 : i32 to vector<1x8xi32>
    %61 = arith.cmpi slt, %50, %60 : vector<1x8xi32>
    %c8_i32_21 = arith.constant 8 : i32
    %62 = vector.broadcast %c8_i32_21 : i32 to vector<1x8xi32>
    %63 = arith.cmpi slt, %50, %62 : vector<1x8xi32>
    %cst_22 = arith.constant -2.500000e-01 : f32
    %cst_23 = arith.constant 0.000000e+00 : f32
    %64 = vector.broadcast %cst_22 : f32 to vector<1x8xf32>
    %65 = vector.broadcast %cst_23 : f32 to vector<1x8xf32>
    %66 = arith.select %63, %64, %65 : vector<1x8xi1>, vector<1x8xf32>
    %cst_24 = arith.constant 2.500000e-01 : f32
    %67 = vector.broadcast %cst_24 : f32 to vector<1x8xf32>
    %68 = arith.select %61, %67, %66 : vector<1x8xi1>, vector<1x8xf32>
    %c0_25 = arith.constant 0 : index
    %69 = memref.load %arg6[%c0_25] : memref<1xf32, #tpu.memory_space<smem>>
    %70 = vector.broadcast %59 : vector<8x1xf32> to vector<8x8xf32>
    %71 = arith.mulf %42, %70 : vector<8x8xf32>
    %72 = vector.broadcast %68 : vector<1x8xf32> to vector<8x8xf32>
    %73 = arith.mulf %71, %72 : vector<8x8xf32>
    %74 = vector.shape_cast %73 : vector<8x8xf32> to vector<1x8x8xf32>
    %cst_26 = arith.constant dense<0.000000e+00> : vector<1xf32>
    %75 = vector.multi_reduction <add>, %74, %cst_26 [1, 2] : vector<1x8x8xf32> to vector<1xf32>
    %76 = vector.shape_cast %75 : vector<1xf32> to vector<1x1x1xf32>
    %77 = vector.extract %76[0, 0, 0] : f32 from vector<1x1x1xf32>
    %78 = arith.addf %69, %77 : f32
    %c0_27 = arith.constant 0 : index
    %79 = memref.load %arg6[%c0_27] : memref<1xf32, #tpu.memory_space<smem>>
    memref.store %78, %arg6[%c0_27] : memref<1xf32, #tpu.memory_space<smem>>
    %c0_28 = arith.constant 0 : index
    %80 = memref.load %arg6[%c0_28] : memref<1xf32, #tpu.memory_space<smem>>
    %c0_29 = arith.constant 0 : index
    %c0_30 = arith.constant 0 : index
    %81 = memref.load %arg5[%c0_29, %c0_30] : memref<1x1xf32, #tpu.memory_space<smem>>
    memref.store %80, %arg5[%c0_29, %c0_30] : memref<1x1xf32, #tpu.memory_space<smem>>
    return
  }
  func.func @transform_0(%arg0: i32, %arg1: i32) -> (i32, i32) {
    %c0_i32 = arith.constant 0 : i32
    %c0_i32_0 = arith.constant 0 : i32
    %c0_i32_1 = arith.constant 0 : i32
    return %c0_i32, %c0_i32_0 : i32, i32
  }
  func.func @transform_1(%arg0: i32, %arg1: i32) -> (i32, i32) {
    %c0_i32 = arith.constant 0 : i32
    %c0_i32_0 = arith.constant 0 : i32
    return %arg0, %c0_i32 : i32, i32
  }
  func.func @transform_2(%arg0: i32, %arg1: i32) -> (i32, i32) {
    %c0_i32 = arith.constant 0 : i32
    %c0_i32_0 = arith.constant 0 : i32
    return %arg1, %c0_i32 : i32, i32
  }
  func.func @transform_3(%arg0: i32, %arg1: i32) -> (i32, i32) {
    %c0_i32 = arith.constant 0 : i32
    %c0_i32_0 = arith.constant 0 : i32
    %c0_i32_1 = arith.constant 0 : i32
    return %c0_i32, %c0_i32_0 : i32, i32
  }
}

</mosaic_0001>

<bundles_post_ra>
// kernel: tpu_custom_call.1
= control target key start
LH: loop header
LB: loop body
LE: loop exit
PB: predicated region body
PF: predicated region fallthrough
CT: control target
= control target key end

     0   :  { %9 = vsyncpa [#allocation5], 0  ;;  %s390_s0 = inlined_call_operand.<no memory space> [shape: f32[1,1], index: 0, kind: input, shape index: {}]   ;;  %s391_s1 = inlined_call_operand.hbm [shape: f32[8,128], index: 1, kind: input, shape index: {}]   ;;  %s392_s2 = inlined_call_operand.hbm [shape: f32[8,128], index: 2, kind: input, shape index: {}]   ;;  %s393_s3 = inlined_call_operand.hbm [shape: f32[1,1], index: 3, kind: output, shape index: {}]  }
   0x1   :  { %10 = vsyncpa [#allocation8], 0 }
   0x2   :  { %11 = vsyncpa [#allocation6], 0  ;;  %s325_s12 = smov [#allocation4]   ;;  %s326_s14 = smov [#allocation7]  }
   0x3   :  { %s20_s13 = sshll.u32 %s325_s12, 4  ;;  %s30_s15 = sshll.u32 %s326_s14, 4  ;;  %s21_s13 = int_to_ptr.vmem [resolvable:$true] %s20_s13  ;;  %s31_s15 = int_to_ptr.vmem [resolvable:$true] %s30_s15 }
   0x4   :  { %s265_s18 = scalar_lea.hbm %s391_s1, 128 }
   0x5   :  { %p266_p0 = scmp.ne.s32.totalorder %s391_s1, %s265_s18  ;;  %p269_p1 = scmp.lt.u32.totalorder %s265_s18, %s391_s1 }
   0x7   :  { %p271_p2 = pnand %p269_p1, %p266_p0 }
   0x9   :  { %274 = shalt.err (!%p271_p2)
}
   0xa   :  { %s275_s23 = scalar_lea.vmem %s21_s13, 128  ;;  %p280_p4 = scmp.lt.s32.totalorder %s21_s13, %s21_s13 }
   0xb   :  { %p276_p3 = scmp.ne.s32.totalorder %s21_s13, %s275_s23  ;;  %p281_p5 = scmp.lt.s32.totalorder %s275_s23, %s275_s23 }
   0xd   :  { %p282_p6 = por %p281_p5, %p280_p4 }
   0xf   :  { %p283_p7 = pnand %p282_p6, %p276_p3 }
  0x11   :  { %286 = shalt.err (!%p283_p7)
}
  0x12   :  { %23 = dma.hbm_to_vmem [thread:$0]  %s391_s1, 128, %s21_s13, [#allocation5]  }
  0x13   :  { %s287_s28 = scalar_lea.hbm %s392_s2, 128 }
  0x14   :  { %p288_p8 = scmp.ne.s32.totalorder %s392_s2, %s287_s28  ;;  %p291_p9 = scmp.lt.u32.totalorder %s287_s28, %s392_s2 }
  0x16   :  { %p293_p10 = pnand %p291_p9, %p288_p8 }
  0x18   :  { %296 = shalt.err (!%p293_p10)
}
  0x19   :  { %s297_s6 = scalar_lea.vmem %s31_s15, 128  ;;  %p302_p12 = scmp.lt.s32.totalorder %s31_s15, %s31_s15 }
  0x1a   :  { %p298_p11 = scmp.ne.s32.totalorder %s31_s15, %s297_s6  ;;  %p303_p13 = scmp.lt.s32.totalorder %s297_s6, %s297_s6 }
  0x1c   :  { %p304_p0 = por %p303_p13, %p302_p12 }
  0x1e   :  { %p305_p1 = pnand %p304_p0, %p298_p11 }
  0x20   :  { %308 = shalt.err (!%p305_p1)
}
  0x21   :  { %33 = dma.hbm_to_vmem [thread:$0]  %s392_s2, 128, %s31_s15, [#allocation8]  }
  0x22   :  { %319 = dma.done.wait [#allocation5], 128  }
  0x23   :  { %320 = vsyncadd [#allocation5], 4294967168 }
  0x24   :  { %321 = dma.done.wait [#allocation8], 128  }
  0x25   :  { %322 = vsyncadd [#allocation8], 4294967168  ;;  %v327_v0 = vmov 0.0   ;;  %vm328_vm0 = vmmov 0   ;;  %v49_v1 = vld [vmem:[#allocation7] sm:$0xff]  ;;  %v48_v3 = vld [vmem:[#allocation4] sm:$0xff]  ;;  %v158_v8 = vlaneseq  ;;  %v167_v17 = vstv %s390_s0 }
  0x26   :  { %242 = vmatprep.subr.mxu0 %v327_v0  ;;  %244 = vmatprep.mubr.msk.f32.mxu0 %vm328_vm0, %v327_v0  ;;  %v123_v2 = vmul.f32 %v49_v1, %v49_v1  ;;  %v120_v4 = vmul.f32 %v48_v3, %v48_v3  ;;  %v329_v39 = vmov -0.25   ;;  %vm208_vm4 = vcmask 64512   ;;  %s309_s11 = scalar_lea.hbm %s393_s3, 16 }
  0x27   :  { %243 = vmatpush3.xpose.msra.mxu0 %v49_v1  ;;  %v159_v9 = vshrl.u32 %v158_v8, 7  ;;  %v194_v29 = vand.u32 127, %v158_v8  ;;  %p310_p2 = scmp.ne.s32.totalorder %s393_s3, %s309_s11  ;;  %p313_p3 = scmp.lt.u32.totalorder %s309_s11, %s393_s3 }
  0x28   :  { %124 = vadd.xlane.f32.xlu0 %v123_v2 }
  0x29   :  { %v160_v10 = vsub.s32 0, %v159_v9  ;;  %vm202_vm1 = vcmp.lt.s32.totalorder %v194_v29, 8  ;;  %vm197_vm2 = vcmp.lt.s32.totalorder %v159_v9, 4  ;;  %vm201_vm3 = vcmp.lt.s32.totalorder %v194_v29, 4  ;;  %p315_p4 = pnand %p313_p3, %p310_p2 }
  0x2a   :  { %245 = vmatmul.mubr.f32.vlgmr.msra.gmra.mrb[0].mxu0 %v48_v3  ;;  %v203_v36 = vsel %vm202_vm1, -0.25, %v327_v0  ;;  %v200_v40 = vsel %vm197_vm2, 0.25, %v329_v39 }
  0x2b   :  { %v204_v42 = vsel %vm201_vm3, 0.25, %v203_v36 }
  0x2c   :  { %121 = vadd.xlane.f32.xlu0 %v120_v4 }
  0xb5   :  { %v125_v5 = vpop.xlane.xlu0 %124 }
  0xb6   :  { %126 = vxpose.xlu1.b32.start.end [1/1] (short) (narrow) %v125_v5, 8 }
  0xb9   :  { %v122_v12 = vpop.xlane.xlu0 %121 }
  0xfd   :  { %v116_v6 = vpop.f32.mrb[0].mxu0 }
  0xfe   :  { %v246_v7 = vpop.f32.mrb[1].mxu0  ;;  %v163_v14 = vmul.f32 2.0, %v116_v6 }
 0x136   :  { %v142_v11 = vpop.trf.xlu1 }
 0x137   :  { %v161_v13 = vrot.slane %v142_v11, %v160_v10 }
 0x139   :  { %v162_v15 = vadd.f32 %v161_v13, %v122_v12 }
 0x13b   :  { %v164_v16 = vsub.f32 %v162_v15, %v163_v14 }
 0x13d   :  { %v165_v18 = vmax.f32 %v164_v16, 0.0 }
 0x13f   :  { %v168_v19 = vmul.f32 %v167_v17, %v165_v18 }
 0x141   :  { %v169_v20 = vmul.f32 1.442695, %v168_v19  ;;  %v171_v21 = vmul.f32 0.5, %v168_v19  ;;  %v175_v22 = vmul.f32 0.25, %v168_v19  ;;  %v179_v23 = vmul.f32 0.125, %v168_v19 }
 0x142   :  { %v183_v26 = vmul.f32 0.0625, %v168_v19 }
 0x143   :  { %v172_v24 = vmul.f32 1.442695, %v171_v21  ;;  %v176_v25 = vmul.f32 1.442695, %v175_v22  ;;  %255 = vpow2.f32 %v169_v20  ;;  %v180_v27 = vmul.f32 1.442695, %v179_v23 }
 0x144   :  { %v184_v28 = vmul.f32 1.442695, %v183_v26 }
 0x145   :  { %257 = vpow2.f32 %v172_v24 }
 0x146   :  { %259 = vpow2.f32 %v176_v25 }
 0x147   :  { %261 = vpow2.f32 %v180_v27 }
 0x148   :  { %263 = vpow2.f32 %v184_v28 }
 0x14d   :  { %v256_v30 = vpop.eup %255 }
 0x14f   :  { %v258_v31 = vpop.eup %257 }
 0x150   :  { %v174_v32 = vadd.f32 %v258_v31, %v256_v30  ;;  %v260_v33 = vpop.eup %259 }
 0x151   :  { %v262_v35 = vpop.eup %261 }
 0x152   :  { %v178_v34 = vadd.f32 %v260_v33, %v174_v32  ;;  %v264_v38 = vpop.eup %263 }
 0x154   :  { %v182_v37 = vadd.f32 %v262_v35, %v178_v34 }
 0x156   :  { %v186_v41 = vadd.f32 %v264_v38, %v182_v37 }
 0x158   :  { %v206_v43 = vmul.f32 %v200_v40, %v186_v41 }
 0x15a   :  { %v207_v44 = vmul.f32 %v206_v43, %v204_v42 }
 0x15c   :  { %v209_v45 = vsel %vm208_vm4, %v207_v44, 0.0 }
 0x15d   :  { %210 = vadd.xlane.f32.xlu1 %v209_v45 }
 0x1ea   :  { %v211_v46 = vpop.xlane.xlu1 %210 }
 0x1eb   :  { %v212_v47 = vrot.slane %v211_v46, 4 }
 0x1ed   :  { %v213_v48 = vadd.f32 %v212_v47, %v211_v46 }
 0x1ef   :  { %v214_v49 = vrot.slane %v213_v48, 2 }
 0x1f1   :  { %v215_v50 = vadd.f32 %v214_v49, %v213_v48 }
 0x1f3   :  { %v216_v51 = vrot.slane %v215_v50, 1 }
 0x1f5   :  { %v217_v52 = vadd.f32 %v216_v51, %v215_v50 }
 0x1f7   :  { %247 = vpush %v217_v52 }
 0x228   :  { %s248_s0 = spop %247 }
 0x229   :  { %224 = sst [smem:[#allocation9]] %s248_s0 }
 0x22a   :  { %318 = shalt.err (!%p315_p4)
}
 0x22b   :  { %s330_s16 = smov [#allocation9]  }
 0x22c   :  { %232 = dma.smem_to_hbm %s330_s16, 16, %s393_s3, [#allocation6]  }
 0x22d   :  { %323 = dma.done.wait [#allocation6], 16  }
 0x22e   :  { %324 = vsyncadd [#allocation6], 4294967280 }
 0x22f   :  { %236 = sfence }
 0x230   :  { %237 = vsyncpa [#allocation5], 1 }
 0x231   :  { %238 = vsyncpa [#allocation8], 1 }
 0x232   :  { %239 = vsyncpa [#allocation6], 1 }

</bundles_post_ra>
